<compile_context>
chip_gen: v6e
topology: v6e:2x2x1
jax: 0.10.0
libtpu: 0.0.40
codegen_flags: <defaults>
</compile_context>

<pallas_src>
import jax
import jax.numpy as jnp
from jax.experimental import pallas as pl
from jax.experimental.pallas import tpu as pltpu

# Module hyper-parameters (consistent with the reference module).
_L = 36            # "laser" portion of the observation
_RS = 4            # "robot state" portion of the observation
IN_DIM = _L + _RS  # 40
HIDDEN = 64        # first body layer width (fixed at 64 in the module)
FEATURE_DIM = 64
PI_DIM = 32
VF_DIM = 32
HEAD_DIM = PI_DIM + VF_DIM   # 64 (fused heads)
HEAD_PAD = 128               # lane-dense fused-head output width
BATCH = 8
MAX_TILE_B = 2048            # batch tile cap; x+out double-buffered tiles are
                             # ~2.6 MiB at 2048 rows -> fits scoped VMEM on
                             # v5e/v6e/v7x without raising vmem_limit_bytes.


def _round_up(n, m):
    return ((n + m - 1) // m) * m


def _choose_tile_b(B):
    """Batch tile: small-B latency path uses one 8-row step; for B>=16 force
    >=2 grid steps so the 'parallel' batch axis can shard across both
    TensorCores on v7x, capped at MAX_TILE_B."""
    if B <= 8:
        return 8
    return min(MAX_TILE_B, _round_up(pl.cdiv(B, 2), 8))


def mlp_arena2d_kernel(x_ref,
                       w1_ref, b1_ref,
                       w2_ref, b2_ref,
                       wh_ref, bh_ref,
                       out_ref):
    """Body (2x Linear+ReLU) + fused policy/value head, all VMEM-resident."""
    x = x_ref[...]                                    # (tile_b, 40)

    # body_net: Linear(40, 64) -> ReLU -> Linear(64, 64) -> ReLU
    h1 = jnp.dot(x, w1_ref[...], preferred_element_type=jnp.float32) + b1_ref[...]
    h1 = jnp.maximum(h1, 0.0)
    h2 = jnp.dot(h1, w2_ref[...], preferred_element_type=jnp.float32) + b2_ref[...]
    h2 = jnp.maximum(h2, 0.0)

    # fused heads: Linear(64, 128) -> ReLU  (cols [0:32]=pi, [32:64]=vf,
    # [64:128]=zero padding so the store is a lane-dense unmasked 128-wide vst)
    head = jnp.dot(h2, wh_ref[...], preferred_element_type=jnp.float32) + bh_ref[...]
    out_ref[...] = jnp.maximum(head, 0.0)


def pack_params(params):
    """One-time packing (call once at init, NOT per forward):
    fuse the pi/vf head weights into a single lane-dense (64, 128) matrix."""
    (w1, b1, w2, b2, wp, bp, wv, bv) = params
    wh = jnp.concatenate([wp, wv], axis=1)                               # (64, 64)
    wh_p = jnp.zeros((FEATURE_DIM, HEAD_PAD), jnp.float32).at[:, :HEAD_DIM].set(wh)
    bh = jnp.concatenate([bp, bv], axis=1)                               # (1, 64)
    bh_p = jnp.zeros((1, HEAD_PAD), jnp.float32).at[:, :HEAD_DIM].set(bh)
    return (w1.astype(jnp.float32), b1.astype(jnp.float32),
            w2.astype(jnp.float32), b2.astype(jnp.float32),
            wh_p, bh_p)


@jax.jit
def mlp_arena2d_forward(x, packed_params):
    """Jitted forward. `packed_params` must come from pack_params()."""
    (w1, b1, w2, b2, wh_p, bh_p) = packed_params
    B = x.shape[0]

    tile_b = _choose_tile_b(B)
    Bp = _round_up(B, tile_b)

    x = x.astype(jnp.float32)
    if Bp != B:                      # pad batch rows only when needed (static)
        x = jnp.pad(x, ((0, Bp - B), (0, 0)))

    grid = (Bp // tile_b,)

    flops = 2 * Bp * (IN_DIM * HIDDEN + HIDDEN * FEATURE_DIM + FEATURE_DIM * HEAD_DIM)
    bytes_accessed = 4 * (Bp * IN_DIM + w1.size + b1.size + w2.size + b2.size
                          + wh_p.size + bh_p.size + Bp * HEAD_PAD)

    out = pl.pallas_call(
        mlp_arena2d_kernel,
        out_shape=jax.ShapeDtypeStruct((Bp, HEAD_PAD), jnp.float32),
        grid=grid,
        in_specs=[
            # x: tiled over batch, full 40-wide last dim (== array dim, legal).
            pl.BlockSpec((tile_b, IN_DIM), lambda i: (i, 0)),
            # weights / biases: full-array blocks with constant index ->
            # fetched once, VMEM-resident across all grid steps.
            pl.BlockSpec((IN_DIM, HIDDEN), lambda i: (0, 0)),
            pl.BlockSpec((1, HIDDEN), lambda i: (0, 0)),
            pl.BlockSpec((HIDDEN, FEATURE_DIM), lambda i: (0, 0)),
            pl.BlockSpec((1, FEATURE_DIM), lambda i: (0, 0)),
            pl.BlockSpec((FEATURE_DIM, HEAD_PAD), lambda i: (0, 0)),
            pl.BlockSpec((1, HEAD_PAD), lambda i: (0, 0)),
        ],
        out_specs=pl.BlockSpec((tile_b, HEAD_PAD), lambda i: (i, 0)),
        compiler_params=pltpu.CompilerParams(
            dimension_semantics=("parallel",)),   # megacore sharding on v7x
        cost_estimate=pl.CostEstimate(
            flops=flops, transcendentals=0, bytes_accessed=bytes_accessed),
    )(x, w1, b1, w2, b2, wh_p, bh_p)

    pi = out[:B, :PI_DIM]
    vf = out[:B, PI_DIM:HEAD_DIM]
    return pi, vf


def init_params(key):
    """Deterministic PyTorch-Linear-style init: U(-1/sqrt(fan_in), 1/sqrt(fan_in))."""
    def linear(key, fan_in, fan_out):
        kw, kb = jax.random.split(key)
        bound = 1.0 / jnp.sqrt(jnp.float32(fan_in))
        w = jax.random.uniform(kw, (fan_in, fan_out), jnp.float32, -bound, bound)
        b = jax.random.uniform(kb, (1, fan_out), jnp.float32, -bound, bound)
        return w, b

    k1, k2, k3, k4 = jax.random.split(key, 4)
    w1, b1 = linear(k1, IN_DIM, HIDDEN)
    w2, b2 = linear(k2, HIDDEN, FEATURE_DIM)
    wp, bp = linear(k3, FEATURE_DIM, PI_DIM)
    wv, bv = linear(k4, FEATURE_DIM, VF_DIM)
    return (w1, b1, w2, b2, wp, bp, wv, bv)


def reference_forward(x, params):
    """Pure-JAX reference for correctness checking."""
    (w1, b1, w2, b2, wp, bp, wv, bv) = params
    h1 = jnp.maximum(x @ w1 + b1, 0.0)
    h2 = jnp.maximum(h1 @ w2 + b2, 0.0)
    pi = jnp.maximum(h2 @ wp + bp, 0.0)
    vf = jnp.maximum(h2 @ wv + bv, 0.0)
    return pi, vf


if __name__ == "__main__":
    key = jax.random.PRNGKey(0)
    k_x, k_p = jax.random.split(key)

    x = jax.random.normal(k_x, (BATCH, IN_DIM), dtype=jnp.float32)
    params = init_params(k_p)

    # One-time packing (head fusion + lane padding) hoisted out of the forward.
    packed = jax.block_until_ready(pack_params(params))

    pi, vf = mlp_arena2d_forward(x, packed)
    jax.block_until_ready((pi, vf))

    # Correctness check against the pure-JAX reference.
    pi_ref, vf_ref = reference_forward(x, params)
    assert pi.shape == (BATCH, PI_DIM) and vf.shape == (BATCH, VF_DIM)
    assert jnp.allclose(pi, pi_ref, atol=1e-5, rtol=1e-5)
    assert jnp.allclose(vf, vf_ref, atol=1e-5, rtol=1e-5)

    print("KERNEL_OK")
</pallas_src>

<mosaic_0001>
module attributes {stable_mosaic.version = 11 : i64} {
  func.func @mlp_arena2d_kernel(%arg0: i32, %arg1: memref<8x40xf32, #tpu.memory_space<vmem>>, %arg2: memref<40x64xf32, #tpu.memory_space<vmem>>, %arg3: memref<1x64xf32, #tpu.memory_space<vmem>>, %arg4: memref<64x64xf32, #tpu.memory_space<vmem>>, %arg5: memref<1x64xf32, #tpu.memory_space<vmem>>, %arg6: memref<64x128xf32, #tpu.memory_space<vmem>>, %arg7: memref<1x128xf32, #tpu.memory_space<vmem>>, %arg8: memref<8x128xf32, #tpu.memory_space<vmem>>) attributes {dimension_semantics = [#tpu.dimension_semantics<parallel>], iteration_bounds = array<i64: 1>, scalar_prefetch = 0 : i64, scratch_operands = 0 : i64, tpu.core_type = #tpu.core_type<tc>, window_params = [{transform_indices = @transform_0, window_bounds = array<i64: 8, 40>}, {pipeline_mode = #tpu.pipeline_mode<synchronous>, transform_indices = @transform_1, window_bounds = array<i64: 40, 64>}, {pipeline_mode = #tpu.pipeline_mode<synchronous>, transform_indices = @transform_2, window_bounds = array<i64: 1, 64>}, {pipeline_mode = #tpu.pipeline_mode<synchronous>, transform_indices = @transform_3, window_bounds = array<i64: 64, 64>}, {pipeline_mode = #tpu.pipeline_mode<synchronous>, transform_indices = @transform_4, window_bounds = array<i64: 1, 64>}, {pipeline_mode = #tpu.pipeline_mode<synchronous>, transform_indices = @transform_5, window_bounds = array<i64: 64, 128>}, {pipeline_mode = #tpu.pipeline_mode<synchronous>, transform_indices = @transform_6, window_bounds = array<i64: 1, 128>}, {transform_indices = @transform_7, window_bounds = array<i64: 8, 128>}]} {
    %c0 = arith.constant 0 : index
    %c0_0 = arith.constant 0 : index
    %0 = vector.load %arg1[%c0, %c0_0] : memref<8x40xf32, #tpu.memory_space<vmem>>, vector<8x40xf32>
    %c0_1 = arith.constant 0 : index
    %c0_2 = arith.constant 0 : index
    %1 = vector.load %arg2[%c0_1, %c0_2] : memref<40x64xf32, #tpu.memory_space<vmem>>, vector<40x64xf32>
    %cst = arith.constant dense<0.000000e+00> : vector<8x64xf32>
    %2 = tpu.matmul %0, %1, %cst {dimension_numbers = #tpu.dot_dimension_numbers<[1], [0], [0], [1], [0, 0, 1, 1], [], []>} : vector<8x40xf32>, vector<40x64xf32>, vector<8x64xf32> -> vector<8x64xf32>
    %c0_3 = arith.constant 0 : index
    %c0_4 = arith.constant 0 : index
    %3 = vector.load %arg3[%c0_3, %c0_4] : memref<1x64xf32, #tpu.memory_space<vmem>>, vector<1x64xf32>
    %4 = vector.broadcast %3 : vector<1x64xf32> to vector<8x64xf32>
    %5 = arith.addf %2, %4 : vector<8x64xf32>
    %cst_5 = arith.constant 0.000000e+00 : f32
    %6 = vector.broadcast %cst_5 : f32 to vector<8x64xf32>
    %7 = arith.maximumf %5, %6 : vector<8x64xf32>
    %c0_6 = arith.constant 0 : index
    %c0_7 = arith.constant 0 : index
    %8 = vector.load %arg4[%c0_6, %c0_7] : memref<64x64xf32, #tpu.memory_space<vmem>>, vector<64x64xf32>
    %cst_8 = arith.constant dense<0.000000e+00> : vector<8x64xf32>
    %9 = tpu.matmul %7, %8, %cst_8 {dimension_numbers = #tpu.dot_dimension_numbers<[1], [0], [0], [1], [0, 0, 1, 1], [], []>} : vector<8x64xf32>, vector<64x64xf32>, vector<8x64xf32> -> vector<8x64xf32>
    %c0_9 = arith.constant 0 : index
    %c0_10 = arith.constant 0 : index
    %10 = vector.load %arg5[%c0_9, %c0_10] : memref<1x64xf32, #tpu.memory_space<vmem>>, vector<1x64xf32>
    %11 = vector.broadcast %10 : vector<1x64xf32> to vector<8x64xf32>
    %12 = arith.addf %9, %11 : vector<8x64xf32>
    %cst_11 = arith.constant 0.000000e+00 : f32
    %13 = vector.broadcast %cst_11 : f32 to vector<8x64xf32>
    %14 = arith.maximumf %12, %13 : vector<8x64xf32>
    %c0_12 = arith.constant 0 : index
    %c0_13 = arith.constant 0 : index
    %15 = vector.load %arg6[%c0_12, %c0_13] : memref<64x128xf32, #tpu.memory_space<vmem>>, vector<64x128xf32>
    %cst_14 = arith.constant dense<0.000000e+00> : vector<8x128xf32>
    %16 = tpu.matmul %14, %15, %cst_14 {dimension_numbers = #tpu.dot_dimension_numbers<[1], [0], [0], [1], [0, 0, 1, 1], [], []>} : vector<8x64xf32>, vector<64x128xf32>, vector<8x128xf32> -> vector<8x128xf32>
    %c0_15 = arith.constant 0 : index
    %c0_16 = arith.constant 0 : index
    %17 = vector.load %arg7[%c0_15, %c0_16] : memref<1x128xf32, #tpu.memory_space<vmem>>, vector<1x128xf32>
    %18 = vector.broadcast %17 : vector<1x128xf32> to vector<8x128xf32>
    %19 = arith.addf %16, %18 : vector<8x128xf32>
    %cst_17 = arith.constant 0.000000e+00 : f32
    %20 = vector.broadcast %cst_17 : f32 to vector<8x128xf32>
    %21 = arith.maximumf %19, %20 : vector<8x128xf32>
    %c0_18 = arith.constant 0 : index
    %c0_19 = arith.constant 0 : index
    %22 = vector.load %arg8[%c0_18, %c0_19] : memref<8x128xf32, #tpu.memory_space<vmem>>, vector<8x128xf32>
    tpu.vector_store %arg8[%c0_18, %c0_19], %21 {strides = array<i32>} : memref<8x128xf32, #tpu.memory_space<vmem>>, vector<8x128xf32>,
    return
  }
  func.func @transform_0(%arg0: i32) -> (i32, i32) {
    %c0_i32 = arith.constant 0 : i32
    %c0_i32_0 = arith.constant 0 : i32
    return %arg0, %c0_i32 : i32, i32
  }
  func.func @transform_1(%arg0: i32) -> (i32, i32) {
    %c0_i32 = arith.constant 0 : i32
    %c0_i32_0 = arith.constant 0 : i32
    %c0_i32_1 = arith.constant 0 : i32
    return %c0_i32, %c0_i32_0 : i32, i32
  }
  func.func @transform_2(%arg0: i32) -> (i32, i32) {
    %c0_i32 = arith.constant 0 : i32
    %c0_i32_0 = arith.constant 0 : i32
    %c0_i32_1 = arith.constant 0 : i32
    return %c0_i32, %c0_i32_0 : i32, i32
  }
  func.func @transform_3(%arg0: i32) -> (i32, i32) {
    %c0_i32 = arith.constant 0 : i32
    %c0_i32_0 = arith.constant 0 : i32
    %c0_i32_1 = arith.constant 0 : i32
    return %c0_i32, %c0_i32_0 : i32, i32
  }
  func.func @transform_4(%arg0: i32) -> (i32, i32) {
    %c0_i32 = arith.constant 0 : i32
    %c0_i32_0 = arith.constant 0 : i32
    %c0_i32_1 = arith.constant 0 : i32
    return %c0_i32, %c0_i32_0 : i32, i32
  }
  func.func @transform_5(%arg0: i32) -> (i32, i32) {
    %c0_i32 = arith.constant 0 : i32
    %c0_i32_0 = arith.constant 0 : i32
    %c0_i32_1 = arith.constant 0 : i32
    return %c0_i32, %c0_i32_0 : i32, i32
  }
  func.func @transform_6(%arg0: i32) -> (i32, i32) {
    %c0_i32 = arith.constant 0 : i32
    %c0_i32_0 = arith.constant 0 : i32
    %c0_i32_1 = arith.constant 0 : i32
    return %c0_i32, %c0_i32_0 : i32, i32
  }
  func.func @transform_7(%arg0: i32) -> (i32, i32) {
    %c0_i32 = arith.constant 0 : i32
    %c0_i32_0 = arith.constant 0 : i32
    return %arg0, %c0_i32 : i32, i32
  }
}

</mosaic_0001>

<bundles_post_ra>
// kernel: mlp_arena2d_forward.1
= control target key start
LH: loop header
LB: loop body
LE: loop exit
PB: predicated region body
PF: predicated region fallthrough
CT: control target
= control target key end

     0   :  { %12 = vsyncpa [#allocation3], 0  ;;  %s639_s0 = inlined_call_operand.hbm [shape: f32[8,40], index: 0, kind: input, shape index: {}]   ;;  %s640_s1 = inlined_call_operand.hbm [shape: f32[40,64], index: 1, kind: input, shape index: {}]   ;;  %s641_s2 = inlined_call_operand.vmem [shape: f32[1,64], index: 2, kind: input, shape index: {}]   ;;  %s642_s3 = inlined_call_operand.hbm [shape: f32[64,64], index: 3, kind: input, shape index: {}]   ;;  %s643_s4 = inlined_call_operand.vmem [shape: f32[1,64], index: 4, kind: input, shape index: {}]   ;;  %s644_s5 = inlined_call_operand.hbm [shape: f32[64,128], index: 5, kind: input, shape index: {}]   ;;  %s645_s6 = inlined_call_operand.vmem [shape: f32[1,128], index: 6, kind: input, shape index: {}]   ;;  %s646_s7 = inlined_call_operand.vmem [shape: f32[8,128], index: 7, kind: output, shape index: {}]  }
   0x1   :  { %13 = vsyncpa [#allocation5], 0 }
   0x2   :  { %14 = vsyncpa [#allocation8], 0  ;;  %s529_s24 = smov [#allocation4]  }
   0x3   :  { %s30_s25 = sshll.u32 %s529_s24, 4  ;;  %s31_s25 = int_to_ptr.vmem [resolvable:$true] %s30_s25 }
   0x4   :  { %s451_s26 = scalar_lea.vmem %s31_s25, 640  ;;  %p456_p1 = scmp.lt.s32.totalorder %s31_s25, %s31_s25 }
   0x5   :  { %p452_p0 = scmp.ne.s32.totalorder %s31_s25, %s451_s26  ;;  %p457_p2 = scmp.lt.s32.totalorder %s451_s26, %s451_s26 }
   0x7   :  { %p458_p3 = por %p457_p2, %p456_p1 }
   0x9   :  { %p459_p4 = pnand %p458_p3, %p452_p0 }
   0xb   :  { %462 = shalt.err (!%p459_p4)
}
   0xc   :  { %s530_s27 = smov 128   ;;  %s531_s28 = smov 8  }
   0xd   :  { %36 = dma.hbm_to_vmem [thread:$0]  %s640_s1, 640, %s31_s25, [#allocation5], %s530_s27, %s530_s27, %s531_s28  }
   0xe   :  { %s532_s8 = smov [#allocation2]   ;;  %s533_s10 = smov [#allocation6]  }
   0xf   :  { %s21_s9 = sshll.u32 %s532_s8, 4  ;;  %s44_s11 = sshll.u32 %s533_s10, 4  ;;  %s22_s9 = int_to_ptr.vmem [resolvable:$true] %s21_s9  ;;  %s45_s11 = int_to_ptr.vmem [resolvable:$true] %s44_s11 }
  0x10   :  { %s471_s12 = scalar_lea.vmem %s22_s9, 128  ;;  %p476_p6 = scmp.lt.s32.totalorder %s22_s9, %s22_s9 }
  0x11   :  { %p472_p5 = scmp.ne.s32.totalorder %s22_s9, %s471_s12  ;;  %p477_p7 = scmp.lt.s32.totalorder %s471_s12, %s471_s12 }
  0x13   :  { %p478_p8 = por %p477_p7, %p476_p6 }
  0x15   :  { %p479_p9 = pnand %p478_p8, %p472_p5 }
  0x17   :  { %482 = shalt.err (!%p479_p9)
}
  0x18   :  { %24 = dma.hbm_to_vmem [thread:$0]  %s639_s0, 128, %s22_s9, [#allocation3]  }
  0x19   :  { %s491_s15 = scalar_lea.vmem %s45_s11, 1024  ;;  %p496_p11 = scmp.lt.s32.totalorder %s45_s11, %s45_s11 }
  0x1a   :  { %p492_p10 = scmp.ne.s32.totalorder %s45_s11, %s491_s15  ;;  %p497_p12 = scmp.lt.s32.totalorder %s491_s15, %s491_s15 }
  0x1c   :  { %p498_p13 = por %p497_p12, %p496_p11 }
  0x1e   :  { %p499_p0 = pnand %p498_p13, %p492_p10 }
  0x20   :  { %502 = shalt.err (!%p499_p0)
}
  0x21   :  { %50 = dma.hbm_to_vmem [thread:$0]  %s642_s3, 1024, %s45_s11, [#allocation5], %s530_s27, %s530_s27, %s531_s28  }
  0x22   :  { %s534_s17 = smov [#allocation7]  }
  0x23   :  { %s58_s18 = sshll.u32 %s534_s17, 4  ;;  %s59_s18 = int_to_ptr.vmem [resolvable:$true] %s58_s18 }
  0x24   :  { %s511_s19 = scalar_lea.vmem %s59_s18, 1024  ;;  %p516_p2 = scmp.lt.s32.totalorder %s59_s18, %s59_s18 }
  0x25   :  { %p512_p1 = scmp.ne.s32.totalorder %s59_s18, %s511_s19  ;;  %p517_p3 = scmp.lt.s32.totalorder %s511_s19, %s511_s19 }
  0x27   :  { %p518_p4 = por %p517_p3, %p516_p2 }
  0x29   :  { %p519_p5 = pnand %p518_p4, %p512_p1 }
  0x2b   :  { %522 = shalt.err (!%p519_p5)
}
  0x2c   :  { %64 = dma.hbm_to_vmem [thread:$0]  %s644_s5, 1024, %s59_s18, [#allocation8], %s530_s27, %s530_s27, %s531_s28  }
  0x2d   :  { %523 = dma.done.wait [#allocation3], 128  }
  0x2e   :  { %524 = vsyncadd [#allocation3], 4294967168 }
  0x2f   :  { %525 = dma.done.wait [#allocation5], 1664  }
  0x30   :  { %526 = vsyncadd [#allocation5], 4294965632 }
  0x31   :  { %527 = dma.done.wait [#allocation8], 1024  }
  0x32   :  { %528 = vsyncadd [#allocation8], 4294966272  ;;  %v535_v0 = vmov 0.0   ;;  %vm536_vm0 = vmmov 0   ;;  %v84_v1 = vld [vmem:[#allocation4 + $0x20] sm:$0xff]  ;;  %v83_v2 = vld [vmem:[#allocation4 + $0x18] sm:$0xff] }
  0x33   :  { %384 = vmatprep.subr.mxu0 %v535_v0  ;;  %394 = vmatprep.mubr.msk.f32.mxu0 %vm536_vm0, %v535_v0  ;;  %v82_v3 = vld [vmem:[#allocation4 + $0x10] sm:$0xff]  ;;  %v174_v4 = vld [vmem:[#allocation6 + $0x38] sm:$0xff]  ;;  %v173_v5 = vld [vmem:[#allocation6 + $0x30] sm:$0xff]  ;;  %vm92_vm1 = vcmask 326656   ;;  %vm182_vm2 = vcmask 523264  }
  0x34   :  { %397 = vmatprep.subr.mxu1 %v535_v0  ;;  %413 = vmatprep.mubr.msk.f32.mxu1 %vm536_vm0, %v535_v0  ;;  %v81_v6 = vld [vmem:[#allocation4 + $0x8] sm:$0xff]  ;;  %v172_v7 = vld [vmem:[#allocation6 + $0x28] sm:$0xff]  ;;  %v80_v8 = vld [vmem:[#allocation4] sm:$0xff] }
  0x35   :  { %385 = vmatpush3.msra.mxu0 %v84_v1  ;;  %398 = vmatpush3.msra.mxu1 %v174_v4  ;;  %v171_v9 = vld [vmem:[#allocation6 + $0x20] sm:$0xff]  ;;  %v79_v10 = vld [vmem:[#allocation2] sm:$0xff]  ;;  %v170_v11 = vld [vmem:[#allocation6 + $0x18] sm:$0xff] }
  0x36   :  { %386 = vmatprep.subr.mxu0 %v535_v0  ;;  %399 = vmatprep.subr.mxu1 %v535_v0  ;;  %v169_v12 = vld [vmem:[#allocation6 + $0x10] sm:$0xff]  ;;  %v168_v13 = vld [vmem:[#allocation6 + $0x8] sm:$0xff]  ;;  %v167_v14 = vld [vmem:[#allocation6] sm:$0xff] }
  0x37   :  { %387 = vmatpush3.msra.mxu0 %v83_v2  ;;  %400 = vmatpush3.msra.mxu1 %v173_v5  ;;  %v264_v15 = vld [vmem:[#allocation7 + $0x38] sm:$0xff]  ;;  %v263_v16 = vld [vmem:[#allocation7 + $0x30] sm:$0xff]  ;;  %v262_v17 = vld [vmem:[#allocation7 + $0x28] sm:$0xff] }
  0x38   :  { %388 = vmatprep.subr.mxu0 %v535_v0  ;;  %401 = vmatprep.subr.mxu1 %v535_v0  ;;  %v261_v18 = vld [vmem:[#allocation7 + $0x20] sm:$0xff]  ;;  %v260_v19 = vld [vmem:[#allocation7 + $0x18] sm:$0xff]  ;;  %v354_v20 = vld [vmem:[%s641_s2] ss:$0 sm:$0xff] }
  0x39   :  { %389 = vmatpush3.msra.mxu0 %v82_v3  ;;  %402 = vmatpush3.msra.mxu1 %v172_v7  ;;  %v259_v25 = vld [vmem:[#allocation7 + $0x10] sm:$0xff]  ;;  %v258_v26 = vld [vmem:[#allocation7 + $0x8] sm:$0xff]  ;;  %v257_v27 = vld [vmem:[#allocation7] sm:$0xff] }
  0x3a   :  { %390 = vmatprep.subr.mxu0 %v535_v0  ;;  %403 = vmatprep.subr.mxu1 %v535_v0  ;;  %v356_v28 = vld [vmem:[%s643_s4] ss:$0 sm:$0xff] }
  0x3b   :  { %391 = vmatpush3.msra.mxu0 %v81_v6  ;;  %404 = vmatpush3.msra.mxu1 %v171_v9  ;;  %v358_v33 = vld [vmem:[%s645_s6] ss:$0 sm:$0xff] }
  0x3c   :  { %392 = vmatprep.subr.mxu0 %v535_v0  ;;  %405 = vmatprep.subr.mxu1 %v535_v0 }
  0x3d   :  { %393 = vmatpush3.msra.mxu0 %v80_v8  ;;  %406 = vmatpush3.msra.mxu1 %v170_v11 }
  0x3e   :  { %395 = vmatmul.mubr.msk.f32.vlgmr.msra.gmra.mxu0 %vm92_vm1, %v79_v10  ;;  %416 = vmatprep.subr.mxu0 %v535_v0 }
  0x3f   :  { %407 = vmatprep.subr.mxu1 %v535_v0  ;;  %432 = vmatprep.mubr.msk.f32.mxu0 %vm536_vm0, %v535_v0 }
  0x40   :  { %408 = vmatpush3.msra.mxu1 %v169_v12  ;;  %417 = vmatpush3.msra.mxu0 %v264_v15 }
  0x41   :  { %409 = vmatprep.subr.mxu1 %v535_v0  ;;  %418 = vmatprep.subr.mxu0 %v535_v0 }
  0x42   :  { %410 = vmatpush3.msra.mxu1 %v168_v13  ;;  %419 = vmatpush3.msra.mxu0 %v263_v16 }
  0x43   :  { %411 = vmatprep.subr.mxu1 %v535_v0  ;;  %420 = vmatprep.subr.mxu0 %v535_v0 }
  0x44   :  { %412 = vmatpush3.msra.mxu1 %v167_v14  ;;  %421 = vmatpush3.msra.mxu0 %v262_v17 }
  0x45   :  { %422 = vmatprep.subr.mxu0 %v535_v0 }
  0x46   :  { %423 = vmatpush3.msra.mxu0 %v261_v18 }
  0x47   :  { %424 = vmatprep.subr.mxu0 %v535_v0 }
  0x48   :  { %425 = vmatpush3.msra.mxu0 %v260_v19 }
  0x49   :  { %426 = vmatprep.subr.mxu0 %v535_v0 }
  0x4a   :  { %427 = vmatpush3.msra.mxu0 %v259_v25 }
  0x4b   :  { %428 = vmatprep.subr.mxu0 %v535_v0 }
  0x4c   :  { %429 = vmatpush3.msra.mxu0 %v258_v26 }
  0x4d   :  { %430 = vmatprep.subr.mxu0 %v535_v0 }
  0x4e   :  { %431 = vmatpush3.msra.mxu0 %v257_v27 }
  0xfe   :  { %v162_v21 = vpop.f32.mrf.mxu0 }
  0xff   :  { %v163_v22 = vadd.f32 %v354_v20, %v162_v21 }
 0x100   :  { %v396_v23 = vpop.f32.mrf.mxu0 }
 0x101   :  { %v166_v24 = vmax.f32 %v163_v22, 0.0 }
 0x103   :  { %414 = vmatmul.mubr.msk.f32.vlgmr.msra.gmra.mxu1 %vm182_vm2, %v166_v24 }
 0x1c3   :  { %v252_v29 = vpop.f32.mrf.mxu1 }
 0x1c4   :  { %v253_v30 = vadd.f32 %v356_v28, %v252_v29 }
 0x1c5   :  { %v415_v31 = vpop.f32.mrf.mxu1 }
 0x1c6   :  { %v256_v32 = vmax.f32 %v253_v30, 0.0 }
 0x1c8   :  { %433 = vmatmul.mubr.msk.f32.vlgmr.msra.gmra.mxu0 %vm182_vm2, %v256_v32 }
 0x288   :  { %v341_v34 = vpop.f32.mrf.mxu0 }
 0x289   :  { %v342_v35 = vadd.f32 %v358_v33, %v341_v34 }
 0x28a   :  { %v434_v36 = vpop.f32.mrf.mxu0 }
 0x28b   :  { %v345_v37 = vmax.f32 %v342_v35, 0.0 }
 0x28d   :  { %346 = vst [vmem:[%s646_s7] sm:$0xff] %v345_v37 }
 0x28e   :  { %351 = vsyncpa [#allocation3], 1 }
 0x28f   :  { %352 = vsyncpa [#allocation5], 1 }
 0x290   :  { %353 = vsyncpa [#allocation8], 1 }

</bundles_post_ra>
